<compile_context>
chip_gen: v7x
topology: tpu7x:2x2x1
jax: 0.10.0
libtpu: 0.0.40
codegen_flags: <defaults>
</compile_context>

<pallas_src>
import functools

import jax
import jax.numpy as jnp
from jax.experimental import pallas as pl
from jax.experimental.pallas import tpu as pltpu


def _round_up(x, m):
    return (x + m - 1) // m * m


def _patch_gemm_kernel(x_ref, w_ref, b_ref, o_ref):
    # (tm, Kp) @ (Kp, tn) on the MXU, f32 accumulate, f32 bias add, cast on store.
    acc = jnp.dot(x_ref[...], w_ref[...], preferred_element_type=jnp.float32)
    o_ref[...] = (acc + b_ref[...]).astype(o_ref.dtype)


def patch_gemm(patches, weight_kd, bias_f32, *, out_dtype):
    """Tiled GEMM + bias.  patches:(M,K), weight:(K,N), bias:(1,N) f32 -> (M,N)."""
    M, K = patches.shape
    Kw, N = weight_kd.shape
    assert K == Kw, (K, Kw)

    in_bytes = jnp.dtype(patches.dtype).itemsize
    out_bytes = jnp.dtype(out_dtype).itemsize

    # Lane-dense contraction dim.
    Kp = _round_up(K, 128)

    # ---- N tiling: prefer ONE lane-dense N tile (weight fetched exactly once,
    # patch stream read exactly once, MXU width fully used).  Pad N up to the
    # tile; the padded columns are sliced off after the call.
    Np_one = _round_up(N, 256) if N > 128 else 128
    if Kp * Np_one * in_bytes <= (8 << 20):
        tn = Np_one
    else:
        tn = 512                       # huge embed dims only
    Np = _round_up(N, tn)

    # ---- generation-aware VMEM budget for tm selection.
    try:
        vmem_cap = int(pltpu.get_tpu_info().vmem_capacity_bytes)
    except Exception:  # pragma: no cover - conservative fallback off-TPU
        vmem_cap = 64 << 20
    if vmem_cap >= (100 << 20):        # v5e / v6e (128 MiB physical)
        budget, limit_cap = 64 << 20, 100 << 20
    else:                              # v7x (64 MiB physical)
        budget, limit_cap = 24 << 20, 40 << 20

    m_cap = _round_up(min(M, 4096), 128)
    tm = 128
    for cand in (4096, 2048, 1024, 512, 256, 128):
        if cand > m_cap:
            continue
        need = (2 * cand * Kp * in_bytes                # patch stream (dbl-buf)
                + 2 * (Kp * tn * in_bytes + tn * 4)     # weight + bias
                + 2 * cand * tn * out_bytes)            # output (dbl-buf)
        if need <= budget:
            tm = cand
            break
    vmem_need = (2 * tm * Kp * in_bytes + 2 * (Kp * tn * in_bytes + tn * 4)
                 + 2 * tm * tn * out_bytes)
    vmem_limit = int(min(vmem_need + (8 << 20), limit_cap))

    Mp = _round_up(M, tm)

    patches_p = patches
    if Mp != M or Kp != K:
        patches_p = jnp.pad(patches, ((0, Mp - M), (0, Kp - K)))
    weight_p = weight_kd
    if Kp != K or Np != N:
        weight_p = jnp.pad(weight_kd, ((0, Kp - K), (0, Np - N)))
    bias_p = bias_f32
    if Np != N:
        bias_p = jnp.pad(bias_f32, ((0, 0), (0, Np - N)))

    # Grid: M outer, N inner.  Patch block index depends only on the outer axis
    # -> the big (M, K) operand is DMA'd from HBM exactly once.  Weight/bias are
    # re-fetched once per outer M step only when N is actually tiled (rare).
    num_m, num_n = Mp // tm, Np // tn
    grid = (num_m, num_n)

    weight_reads = 1 if num_n == 1 else num_m
    cost = pl.CostEstimate(
        flops=2 * Mp * Kp * Np,
        transcendentals=0,
        bytes_accessed=int(Mp * Kp * in_bytes
                           + weight_reads * Kp * Np * in_bytes
                           + weight_reads * Np * 4
                           + Mp * Np * out_bytes),
    )

    out = pl.pallas_call(
        _patch_gemm_kernel,
        out_shape=jax.ShapeDtypeStruct((Mp, Np), out_dtype),
        grid_spec=pltpu.PrefetchScalarGridSpec(
            num_scalar_prefetch=0,
            grid=grid,
            in_specs=[
                pl.BlockSpec((tm, Kp), lambda i, j: (i, 0)),   # patch stream (read once)
                pl.BlockSpec((Kp, tn), lambda i, j: (0, j)),   # weight
                pl.BlockSpec((1, tn), lambda i, j: (0, j)),    # bias
            ],
            out_specs=pl.BlockSpec((tm, tn), lambda i, j: (i, j)),
        ),
        compiler_params=pltpu.CompilerParams(
            dimension_semantics=("parallel", "arbitrary"),
            vmem_limit_bytes=vmem_limit,
            allow_input_fusion=[True, False, False],
        ),
        cost_estimate=cost,
    )(patches_p, weight_p, bias_p)

    if Mp != M or Np != N:
        out = out[:M, :N]
    return out


def calculate_padding(img_dim, patch_dim):
    # Exact replica of PatchEmbed.calculate_padding (static Python).
    H = img_dim
    H_pad = [0, 0]
    if H % patch_dim != 0:
        if H % 2 == 1:
            H_pad[0] += 1
        H_pad[0] += (patch_dim - H % patch_dim) // 2
        H_pad[1] += (patch_dim - H % patch_dim) // 2
    return H_pad


def patch_embed_forward(x, conv_weight, conv_bias, patch_size, *,
                        compute_dtype=None, channels_last=False):
    """
    x           : (B, C, H, W)   PyTorch NCHW convention
    conv_weight : (D, C, P, P)   nn.Conv2d weight
    conv_bias   : (D,)
    returns     : (B, D, H_new, W_new)  (or (B, H_new, W_new, D) if channels_last)
    """
    B, C, H, W = x.shape
    D = conv_weight.shape[0]
    P = patch_size
    out_dtype = x.dtype
    if compute_dtype is None:
        compute_dtype = x.dtype        # f32 in -> f32 compute: parity with PyTorch

    pad_h = calculate_padding(H, P)
    pad_w = calculate_padding(W, P)
    Hp = H + pad_h[0] + pad_h[1]
    Wp = W + pad_w[0] + pad_w[1]
    if Hp % P != 0 or Wp % P != 0:
        raise ValueError(
            f"padded size ({Hp},{Wp}) not divisible by patch_size={P}; "
            f"PatchEmbed padding heuristic does not cover this (H,W)."
        )

    x = jnp.pad(x, ((0, 0), (0, 0), (pad_h[0], pad_h[1]), (pad_w[0], pad_w[1])))
    Hn, Wn = Hp // P, Wp // P

    # Patch extraction (pure layout).  allow_input_fusion on the patch operand
    # lets XLA fold this chain into the kernel's input DMA where possible.
    xp = x.reshape(B, C, Hn, P, Wn, P)
    xp = jnp.transpose(xp, (0, 2, 4, 1, 3, 5))              # (B, Hn, Wn, C, P, P)
    patches = xp.reshape(B * Hn * Wn, C * P * P).astype(compute_dtype)

    w_kd = conv_weight.reshape(D, C * P * P).T.astype(compute_dtype)   # (K, D)
    b_1d = conv_bias.astype(jnp.float32).reshape(1, D)                  # (1, D) f32

    out = patch_gemm(patches, w_kd, b_1d, out_dtype=out_dtype)          # (M, D)
    out = out.reshape(B, Hn, Wn, D)
    if channels_last:
        # Lane-dense layout for consumers that flatten to (B, N, D) tokens.
        return out
    # NCHW to match nn.Conv2d: one XLA transpose on the lane-dense result.
    return jnp.transpose(out, (0, 3, 1, 2))


if __name__ == "__main__":
    B, C, patch_size, embed_dim = 2, 4, 4, 32

    key = jax.random.PRNGKey(0)
    kx, kw, kb = jax.random.split(key, 3)
    conv_weight = jax.random.normal(
        kw, (embed_dim, C, patch_size, patch_size), dtype=jnp.float32) * 0.02
    conv_bias = jax.random.normal(kb, (embed_dim,), dtype=jnp.float32) * 0.02

    fwd_f32 = jax.jit(functools.partial(
        patch_embed_forward, patch_size=patch_size))
    fwd_bf16 = jax.jit(functools.partial(
        patch_embed_forward, patch_size=patch_size, compute_dtype=jnp.bfloat16))

    # Two spatial sizes: 16x16 (no padding) and 18x22 (exercises the padding path).
    for (H, W) in ((16, 16), (18, 22)):
        x = jax.random.normal(jax.random.fold_in(kx, 1000 * H + W),
                              (B, C, H, W), dtype=jnp.float32)

        pad_h = calculate_padding(H, patch_size)
        pad_w = calculate_padding(W, patch_size)
        ref = jax.lax.conv_general_dilated(
            x, conv_weight,
            window_strides=(patch_size, patch_size),
            padding=((pad_h[0], pad_h[1]), (pad_w[0], pad_w[1])),
            dimension_numbers=("NCHW", "OIHW", "NCHW"),
        ) + conv_bias.reshape(1, embed_dim, 1, 1)
        ref = jax.block_until_ready(ref)

        # f32 compute path (default): matches the f32 Conv2d closely.
        out_f32 = jax.block_until_ready(fwd_f32(x, conv_weight, conv_bias))
        assert out_f32.shape == ref.shape, (out_f32.shape, ref.shape)
        assert jnp.allclose(out_f32, ref, atol=5e-3, rtol=5e-3), (
            float(jnp.max(jnp.abs(out_f32 - ref))))

        # bf16 compute path (explicit opt-in, MXU-friendly): looser tolerance.
        out_bf16 = jax.block_until_ready(fwd_bf16(x, conv_weight, conv_bias))
        assert out_bf16.shape == ref.shape
        assert jnp.allclose(out_bf16, ref, atol=5e-2, rtol=5e-2), (
            float(jnp.max(jnp.abs(out_bf16 - ref))))

    print("KERNEL_OK")
</pallas_src>

<mosaic_0001>
module attributes {stable_mosaic.version = 11 : i64} {
  func.func @_patch_gemm_kernel(%arg0: i32, %arg1: i32, %arg2: memref<128x128xf32, #tpu.memory_space<vmem>>, %arg3: memref<128x128xf32, #tpu.memory_space<vmem>>, %arg4: memref<1x128xf32, #tpu.memory_space<vmem>>, %arg5: memref<128x128xf32, #tpu.memory_space<vmem>>) attributes {dimension_semantics = [#tpu.dimension_semantics<parallel>, #tpu.dimension_semantics<arbitrary>], iteration_bounds = array<i64: 1, 1>, scalar_prefetch = 0 : i64, scratch_operands = 0 : i64, tpu.core_type = #tpu.core_type<tc>, window_params = [{transform_indices = @transform_0, window_bounds = array<i64: 128, 128>}, {transform_indices = @transform_1, window_bounds = array<i64: 128, 128>}, {transform_indices = @transform_2, window_bounds = array<i64: 1, 128>}, {transform_indices = @transform_3, window_bounds = array<i64: 128, 128>}]} {
    %c0 = arith.constant 0 : index
    %c0_0 = arith.constant 0 : index
    %0 = vector.load %arg2[%c0, %c0_0] : memref<128x128xf32, #tpu.memory_space<vmem>>, vector<128x128xf32>
    %c0_1 = arith.constant 0 : index
    %c0_2 = arith.constant 0 : index
    %1 = vector.load %arg3[%c0_1, %c0_2] : memref<128x128xf32, #tpu.memory_space<vmem>>, vector<128x128xf32>
    %cst = arith.constant dense<0.000000e+00> : vector<128x128xf32>
    %2 = tpu.matmul %0, %1, %cst {dimension_numbers = #tpu.dot_dimension_numbers<[1], [0], [0], [1], [0, 0, 1, 1], [], []>} : vector<128x128xf32>, vector<128x128xf32>, vector<128x128xf32> -> vector<128x128xf32>
    %c0_3 = arith.constant 0 : index
    %c0_4 = arith.constant 0 : index
    %3 = vector.load %arg4[%c0_3, %c0_4] : memref<1x128xf32, #tpu.memory_space<vmem>>, vector<1x128xf32>
    %4 = vector.broadcast %3 : vector<1x128xf32> to vector<128x128xf32>
    %5 = arith.addf %2, %4 : vector<128x128xf32>
    %c0_5 = arith.constant 0 : index
    %c0_6 = arith.constant 0 : index
    %6 = vector.load %arg5[%c0_5, %c0_6] : memref<128x128xf32, #tpu.memory_space<vmem>>, vector<128x128xf32>
    tpu.vector_store %arg5[%c0_5, %c0_6], %5 {strides = array<i32>} : memref<128x128xf32, #tpu.memory_space<vmem>>, vector<128x128xf32>,
    return
  }
  func.func @transform_0(%arg0: i32, %arg1: i32) -> (i32, i32) {
    %c0_i32 = arith.constant 0 : i32
    %c0_i32_0 = arith.constant 0 : i32
    return %arg0, %c0_i32 : i32, i32
  }
  func.func @transform_1(%arg0: i32, %arg1: i32) -> (i32, i32) {
    %c0_i32 = arith.constant 0 : i32
    %c0_i32_0 = arith.constant 0 : i32
    return %c0_i32, %arg1 : i32, i32
  }
  func.func @transform_2(%arg0: i32, %arg1: i32) -> (i32, i32) {
    %c0_i32 = arith.constant 0 : i32
    %c0_i32_0 = arith.constant 0 : i32
    return %c0_i32, %arg1 : i32, i32
  }
  func.func @transform_3(%arg0: i32, %arg1: i32) -> (i32, i32) {
    %c0_i32 = arith.constant 0 : i32
    return %arg0, %arg1 : i32, i32
  }
}

</mosaic_0001>

<bundles_post_ra>
// kernel: patch_embed_forward.2
= control target key start
LH: loop header
LB: loop body
LE: loop exit
PB: predicated region body
PF: predicated region fallthrough
CT: control target
= control target key end

     0   :  { %v17_v4 = vlaneseq  ;;  %s602_s0 = inlined_call_operand.vmem [shape: f32[128,128], index: 0, kind: input, shape index: {}]   ;;  %s603_s1 = inlined_call_operand.vmem [shape: f32[1,128], index: 1, kind: input, shape index: {}]   ;;  %s604_s2 = inlined_call_operand.vmem [shape: f32[32,64], index: 2, kind: input, shape index: {}]   ;;  %s605_s3 = inlined_call_operand.<no memory space> [shape: f32[], index: 3, kind: input, shape index: {}]   ;;  %s606_s4 = inlined_call_operand.vmem [shape: f32[128,128], index: 4, kind: output, shape index: {}]  }
   0x1   :  { %v462_v0 = vstv %s605_s3  ;;  %v106_v1 = vld [vmem:[%s602_s0] sm:$0xff]  ;;  %v107_v2 = vld [vmem:[%s602_s0 + $0x8] sm:$0xff]  ;;  %v108_v3 = vld [vmem:[%s602_s0 + $0x10] sm:$0xff] }
   0x2   :  { %374 = vmatprep.mubr.f32.mxu1 %v462_v0  ;;  %v386_v5 = vpack.c.bf16 %v107_v2, %v106_v1  ;;  %v109_v6 = vld [vmem:[%s602_s0 + $0x18] sm:$0xff]  ;;  %v110_v8 = vld [vmem:[%s602_s0 + $0x20] sm:$0xff]  ;;  %v111_v9 = vld [vmem:[%s602_s0 + $0x28] sm:$0xff]  ;;  %v483_v10 = vand.u32 127, %v17_v4 }
   0x3   :  { %v390_v7 = vpack.c.bf16 %v109_v6, %v108_v3  ;;  %v394_v11 = vpack.c.bf16 %v111_v9, %v110_v8  ;;  %v16_v12 = vld [vmem:[%s604_s2] sm:$0xff]  ;;  %v112_v13 = vld [vmem:[%s602_s0 + $0x30] sm:$0xff]  ;;  %v113_v14 = vld [vmem:[%s602_s0 + $0x38] sm:$0xff] }
   0x4   :  { %387 = vmatprep.subr.bf16.mxu0 %v386_v5  ;;  %418 = vmatprep.subr.bf16.mxu1 %v386_v5  ;;  %vm20_vm0 = vcmp.lt.s32.totalorder %v483_v10, 64  ;;  %v398_v16 = vpack.c.bf16 %v113_v14, %v112_v13  ;;  %v114_v17 = vld [vmem:[%s602_s0 + $0x40] sm:$0xff]  ;;  %v115_v18 = vld [vmem:[%s602_s0 + $0x48] sm:$0xff]  ;;  %v116_v20 = vld [vmem:[%s602_s0 + $0x50] sm:$0xff] }
   0x5   :  { %389 = vmatpush3.bf16.msra.mxu0 %v386_v5  ;;  %426 = vmatpush3.bf16.msra.mxu1 %v386_v5  ;;  %v21_v15 = vsel %vm20_vm0, %v16_v12, %v462_v0  ;;  %v402_v19 = vpack.c.bf16 %v115_v18, %v114_v17  ;;  %v117_v21 = vld [vmem:[%s602_s0 + $0x58] sm:$0xff]  ;;  %v118_v23 = vld [vmem:[%s602_s0 + $0x60] sm:$0xff]  ;;  %v119_v24 = vld [vmem:[%s602_s0 + $0x68] sm:$0xff] }
   0x6   :  { %391 = vmatprep.subr.bf16.mxu0 %v390_v7  ;;  %419 = vmatprep.subr.bf16.mxu1 %v390_v7  ;;  %v406_v22 = vpack.c.bf16 %v117_v21, %v116_v20  ;;  %v410_v25 = vpack.c.bf16 %v119_v24, %v118_v23  ;;  %v120_v26 = vld [vmem:[%s602_s0 + $0x70] sm:$0xff]  ;;  %v121_v27 = vld [vmem:[%s602_s0 + $0x78] sm:$0xff]  ;;  %v294_v29 = vld [vmem:[%s604_s2 + $0x8] sm:$0xff] }
   0x7   :  { %362 = vmatprep.mubr.f32.mxu0 %v21_v15  ;;  %v414_v28 = vpack.c.bf16 %v121_v27, %v120_v26  ;;  %v295_v30 = vld [vmem:[%s604_s2 + $0x10] sm:$0xff]  ;;  %v30_v31 = vsel %vm20_vm0, %v294_v29, %v462_v0  ;;  %v296_v33 = vld [vmem:[%s604_s2 + $0x18] sm:$0xff]  ;;  %v297_v35 = vld [vmem:[%s603_s1] ss:$0 sm:$0xff] }
   0x8   :  { %v40_v32 = vsel %vm20_vm0, %v295_v30, %v462_v0  ;;  %v50_v34 = vsel %vm20_vm0, %v296_v33, %v462_v0 }
   0x9   :  { %393 = vmatpush3.bf16.msra.mxu0 %v390_v7  ;;  %427 = vmatpush3.bf16.msra.mxu1 %v390_v7 }
   0xa   :  { %395 = vmatprep.subr.bf16.mxu0 %v394_v11  ;;  %420 = vmatprep.subr.bf16.mxu1 %v394_v11 }
   0xd   :  { %397 = vmatpush3.bf16.msra.mxu0 %v394_v11  ;;  %428 = vmatpush3.bf16.msra.mxu1 %v394_v11 }
   0xe   :  { %399 = vmatprep.subr.bf16.mxu0 %v398_v16  ;;  %421 = vmatprep.subr.bf16.mxu1 %v398_v16 }
  0x11   :  { %401 = vmatpush3.bf16.msra.mxu0 %v398_v16  ;;  %429 = vmatpush3.bf16.msra.mxu1 %v398_v16 }
  0x12   :  { %403 = vmatprep.subr.bf16.mxu0 %v402_v19  ;;  %422 = vmatprep.subr.bf16.mxu1 %v402_v19 }
  0x15   :  { %405 = vmatpush3.bf16.msra.mxu0 %v402_v19  ;;  %430 = vmatpush3.bf16.msra.mxu1 %v402_v19 }
  0x16   :  { %407 = vmatprep.subr.bf16.mxu0 %v406_v22  ;;  %423 = vmatprep.subr.bf16.mxu1 %v406_v22 }
  0x19   :  { %409 = vmatpush3.bf16.msra.mxu0 %v406_v22  ;;  %431 = vmatpush3.bf16.msra.mxu1 %v406_v22 }
  0x1a   :  { %411 = vmatprep.subr.bf16.mxu0 %v410_v25  ;;  %424 = vmatprep.subr.bf16.mxu1 %v410_v25 }
  0x1d   :  { %413 = vmatpush3.bf16.msra.mxu0 %v410_v25  ;;  %432 = vmatpush3.bf16.msra.mxu1 %v410_v25 }
  0x1e   :  { %415 = vmatprep.subr.bf16.mxu0 %v414_v28  ;;  %425 = vmatprep.subr.bf16.mxu1 %v414_v28 }
  0x21   :  { %417 = vmatpush3.bf16.msra.mxu0 %v414_v28  ;;  %433 = vmatpush3.bf16.msra.mxu1 %v414_v28 }
  0x24   :  { %363 = vmatmul.mubr.f32.vlgmr.msra.gmra.mrb[0].mxu0 %v30_v31  ;;  %375 = vmatmul.mubr.f32.vlgmr.msra.gmra.mrb[0].mxu1 %v462_v0 }
  0x25   :  { %365 = vmatprep.mubr.f32.mxu0 %v40_v32  ;;  %377 = vmatprep.mubr.f32.mxu1 %v462_v0 }
  0x28   :  { %366 = vmatmul.mubr.f32.gmra.mrb[2].mxu0 %v50_v34  ;;  %378 = vmatmul.mubr.f32.gmra.mrb[2].mxu1 %v462_v0 }
  0x29   :  { %368 = vmatprep.mubr.f32.mxu0 %v462_v0  ;;  %380 = vmatprep.mubr.f32.mxu1 %v462_v0 }
  0x2c   :  { %369 = vmatmul.mubr.f32.gmra.mrb[4].mxu0 %v462_v0  ;;  %381 = vmatmul.mubr.f32.gmra.mrb[4].mxu1 %v462_v0 }
  0x2d   :  { %371 = vmatprep.mubr.f32.mxu0 %v462_v0  ;;  %383 = vmatprep.mubr.f32.mxu1 %v462_v0 }
  0x30   :  { %372 = vmatmul.mubr.f32.gmra.mrb[6].mxu0 %v462_v0  ;;  %384 = vmatmul.mubr.f32.gmra.mrb[6].mxu1 %v462_v0 }
  0xf7   :  { %v364_v36 = vpop.f32.mrb[0].mxu0  ;;  %v376_v37 = vpop.f32.mrb[0].mxu1 }
  0xf8   :  { %v201_v38 = vadd.f32 %v364_v36, %v297_v35  ;;  %v241_v39 = vadd.f32 %v376_v37, %v297_v35  ;;  %v195_v40 = vpop.f32.mrb[1].mxu0  ;;  %v235_v41 = vpop.f32.mrb[1].mxu1 }
  0xf9   :  { %v196_v42 = vadd.f32 %v297_v35, %v195_v40  ;;  %v236_v43 = vadd.f32 %v297_v35, %v235_v41 }
  0xfa   :  { %275 = vst [vmem:[%s606_s4 + $0x8] sm:$0xff] %v201_v38  ;;  %283 = vst [vmem:[%s606_s4 + $0x48] sm:$0xff] %v241_v39 }
  0xfb   :  { %274 = vst [vmem:[%s606_s4] sm:$0xff] %v196_v42  ;;  %282 = vst [vmem:[%s606_s4 + $0x40] sm:$0xff] %v236_v43  ;;  %v367_v44 = vpop.f32.mrb[2].mxu0  ;;  %v379_v45 = vpop.f32.mrb[2].mxu1 }
  0xfc   :  { %v211_v46 = vadd.f32 %v367_v44, %v297_v35  ;;  %v251_v47 = vadd.f32 %v379_v45, %v297_v35  ;;  %v205_v48 = vpop.f32.mrb[3].mxu0  ;;  %v245_v49 = vpop.f32.mrb[3].mxu1 }
  0xfd   :  { %v206_v50 = vadd.f32 %v297_v35, %v205_v48  ;;  %v246_v51 = vadd.f32 %v297_v35, %v245_v49 }
  0xfe   :  { %277 = vst [vmem:[%s606_s4 + $0x18] sm:$0xff] %v211_v46  ;;  %285 = vst [vmem:[%s606_s4 + $0x58] sm:$0xff] %v251_v47 }
  0xff   :  { %276 = vst [vmem:[%s606_s4 + $0x10] sm:$0xff] %v206_v50  ;;  %284 = vst [vmem:[%s606_s4 + $0x50] sm:$0xff] %v246_v51  ;;  %v370_v52 = vpop.f32.mrb[4].mxu0  ;;  %v382_v53 = vpop.f32.mrb[4].mxu1 }
 0x100   :  { %v221_v54 = vadd.f32 %v370_v52, %v297_v35  ;;  %v261_v55 = vadd.f32 %v382_v53, %v297_v35  ;;  %v215_v56 = vpop.f32.mrb[5].mxu0  ;;  %v255_v57 = vpop.f32.mrb[5].mxu1 }
 0x101   :  { %v216_v58 = vadd.f32 %v297_v35, %v215_v56  ;;  %v256_v59 = vadd.f32 %v297_v35, %v255_v57 }
 0x102   :  { %279 = vst [vmem:[%s606_s4 + $0x28] sm:$0xff] %v221_v54  ;;  %287 = vst [vmem:[%s606_s4 + $0x68] sm:$0xff] %v261_v55 }
 0x103   :  { %278 = vst [vmem:[%s606_s4 + $0x20] sm:$0xff] %v216_v58  ;;  %286 = vst [vmem:[%s606_s4 + $0x60] sm:$0xff] %v256_v59  ;;  %v373_v60 = vpop.f32.mrb[6].mxu0  ;;  %v385_v61 = vpop.f32.mrb[6].mxu1 }
 0x104   :  { %v231_v62 = vadd.f32 %v373_v60, %v297_v35  ;;  %v271_v63 = vadd.f32 %v385_v61, %v297_v35  ;;  %v225_v0 = vpop.f32.mrb[7].mxu0  ;;  %v265_v1 = vpop.f32.mrb[7].mxu1 }
 0x105   :  { %v226_v2 = vadd.f32 %v297_v35, %v225_v0  ;;  %v266_v3 = vadd.f32 %v297_v35, %v265_v1 }
 0x106   :  { %281 = vst [vmem:[%s606_s4 + $0x38] sm:$0xff] %v231_v62  ;;  %289 = vst [vmem:[%s606_s4 + $0x78] sm:$0xff] %v271_v63 }
 0x107   :  { %280 = vst [vmem:[%s606_s4 + $0x30] sm:$0xff] %v226_v2  ;;  %288 = vst [vmem:[%s606_s4 + $0x70] sm:$0xff] %v266_v3 }

</bundles_post_ra>
